<compile_context>
chip_gen: v7x
topology: tpu7x:2x2x1
jax: 0.10.0
libtpu: 0.0.40
codegen_flags: <defaults>
</compile_context>

<pallas_src>
import functools
import math

import jax
import jax.numpy as jnp
from jax.experimental import pallas as pl
from jax.experimental.pallas import tpu as pltpu

_LANE = 128
_SUB = 8
# 1024 rows x 128 lanes x 4 B = 512 KiB per f32 block.  Up to 6 streamed
# inputs x 2 pipeline buffers ~= 6 MiB of VMEM -- comfortably inside the
# default scoped-VMEM budget on every generation (16 MiB v5e, 32 MiB v6e/v7x).
_TARGET_BLOCK_ROWS = 1024

_GROUP_KEYS = ("h", "l", "z_h", "z_l")


def _prep_slab(arrays, pad_value):
    """Flatten a list of arrays into a (rows, 128) slab with minimal copies.

    Single-tensor, 128-aligned inputs are a pure reshape (no copy); otherwise
    only the tiny tail is padded with a value that is neutral for the term
    (1.0 -> log() == 0, or 0.0 -> squared diff == 0)."""
    flats = [a.reshape(-1) for a in arrays]
    flat = flats[0] if len(flats) == 1 else jnp.concatenate(flats)
    n = flat.shape[0]
    rem = (-n) % _LANE
    if rem:
        flat = jnp.concatenate(
            [flat, jnp.full((rem,), pad_value, dtype=flat.dtype)])
    return flat.reshape(-1, _LANE), n


def _stream_meta(rows):
    """Per-slab (rows, block_rows, nblocks)."""
    if rows <= _TARGET_BLOCK_ROWS:
        return rows, rows, 1            # single full-extent block (always legal)
    return rows, _TARGET_BLOCK_ROWS, pl.cdiv(rows, _TARGET_BLOCK_ROWS)


def _in_spec(rows, block_rows, nblocks):
    if nblocks == 1:
        return pl.BlockSpec((rows, _LANE), lambda i: (0, 0))
    # Clamp: once this stream is exhausted the block index stops changing, so
    # no further DMA is issued; the compute is pl.when-gated in the kernel.
    return pl.BlockSpec(
        (block_rows, _LANE),
        lambda i, _nb=nblocks: (jnp.minimum(i, _nb - 1), 0))


def _partial_sublane_sum(x):
    """Reduce a (rows, 128) f32 block to a single-vreg (8, 128) partial sum
    using leading-axis adds (pure VPU for the 8-row-aligned bulk)."""
    rows = x.shape[0]
    main = (rows // _SUB) * _SUB
    out = jnp.zeros((_SUB, _LANE), jnp.float32)
    if main:
        out = out + x[:main].reshape(main // _SUB, _SUB, _LANE).sum(axis=0)
    if rows > main:
        tail = jnp.sum(x[main:], axis=0, keepdims=True)            # (1, 128)
        row0 = jax.lax.broadcasted_iota(jnp.int32, (_SUB, _LANE), 0) == 0
        out = out + jnp.where(row0, jnp.broadcast_to(tail, (_SUB, _LANE)), 0.0)
    return out


def _build_kernel(rate_meta, mse_meta, num_steps):
    """rate_meta: list of (rows, block_rows, nblocks) per likelihood group.
    mse_meta: (rows, block_rows, nblocks) shared by x_hat / target."""
    n_groups = len(rate_meta)
    n_terms = n_groups + 1

    def kernel(*refs):
        in_refs = refs[:n_groups + 2]
        o_ref = refs[n_groups + 2]
        acc_ref = refs[n_groups + 3]
        i = pl.program_id(0)

        @pl.when(i == 0)
        def _init():
            acc_ref[...] = jnp.zeros_like(acc_ref)

        def row_mask(rows, block_rows, nblocks):
            # Valid-row mask for the current block (None when always valid).
            if nblocks == 1 or rows % block_rows == 0:
                return None
            start = jnp.minimum(i, nblocks - 1) * block_rows
            ridx = start + jax.lax.broadcasted_iota(
                jnp.int32, (block_rows, _LANE), 0)
            return ridx < rows

        def guarded(nblocks, fn):
            if nblocks == num_steps:
                fn()
            else:
                pl.when(i < nblocks)(fn)

        # ----- rate terms: sum(log(likelihoods)) per group ------------------
        for g in range(n_groups):
            rows, brows, nb = rate_meta[g]

            def do_rate(g=g, rows=rows, brows=brows, nb=nb):
                x = in_refs[g][...].astype(jnp.float32)
                contrib = jnp.log(x)
                m = row_mask(rows, brows, nb)
                if m is not None:
                    contrib = jnp.where(m, contrib, 0.0)
                acc_ref[g] += _partial_sublane_sum(contrib)

            guarded(nb, do_rate)

        # ----- distortion term: sum((x_hat - target)^2) ----------------------
        rows_m, brows_m, nb_m = mse_meta

        def do_mse():
            a = in_refs[n_groups][...].astype(jnp.float32)
            b = in_refs[n_groups + 1][...].astype(jnp.float32)
            d = a - b
            contrib = d * d
            m = row_mask(rows_m, brows_m, nb_m)
            if m is not None:
                contrib = jnp.where(m, contrib, 0.0)
            acc_ref[n_groups] += _partial_sublane_sum(contrib)

        guarded(nb_m, do_mse)

        # ----- final in-kernel cross-lane reduction (last step only) ---------
        @pl.when(i == num_steps - 1)
        def _finalize():
            for t in range(n_terms):
                lane_sum = jnp.sum(acc_ref[t], axis=1, keepdims=True)  # (8, 1)
                total = jnp.sum(lane_sum, axis=0, keepdims=True)       # (1, 1)
                o_ref[t] = jnp.broadcast_to(total, (_SUB, _LANE))

    return kernel


@functools.partial(jax.jit, static_argnames=("lmbda",))
def rate_distortion_loss2(output, target, lmbda=0.01):
    """JAX/Pallas equivalent of RateDistortionLoss2.forward.

    output: dict with keys
        'likelihoods': dict {'h': [arrays], 'l': [arrays],
                             'z_h': [arrays], 'z_l': [arrays]}
        'x_hat': array shaped like target (N, C, H, W)
    target: (N, C, H, W) array
    """
    N, _, H, W = target.shape
    num_pixels = N * H * W

    lk = output["likelihoods"]

    slabs, metas = [], []
    for kname in _GROUP_KEYS:
        ts = lk[kname]
        if not isinstance(ts, (list, tuple)):
            ts = [ts]
        slab, _ = _prep_slab(ts, pad_value=1.0)       # log(1) = 0 is neutral
        slabs.append(slab)
        metas.append(_stream_meta(slab.shape[0]))

    xhat2d, _ = _prep_slab([output["x_hat"]], pad_value=0.0)
    tgt2d, _ = _prep_slab([target], pad_value=0.0)    # identical zero pad
    mse_meta = _stream_meta(xhat2d.shape[0])
    n_mse = target.size

    num_steps = max([m[2] for m in metas] + [mse_meta[2]])
    n_terms = len(_GROUP_KEYS) + 1

    kernel = _build_kernel(metas, mse_meta, num_steps)

    in_specs = [_in_spec(*m) for m in metas]
    in_specs += [_in_spec(*mse_meta), _in_spec(*mse_meta)]

    partial = pl.pallas_call(
        kernel,
        out_shape=jax.ShapeDtypeStruct((n_terms, _SUB, _LANE), jnp.float32),
        grid_spec=pltpu.PrefetchScalarGridSpec(
            num_scalar_prefetch=0,
            grid=(num_steps,),
            in_specs=in_specs,
            out_specs=pl.BlockSpec((n_terms, _SUB, _LANE),
                                   lambda i: (0, 0, 0)),
            scratch_shapes=[pltpu.VMEM((n_terms, _SUB, _LANE), jnp.float32)],
        ),
        compiler_params=pltpu.CompilerParams(
            dimension_semantics=("arbitrary",)),
    )(*slabs, xhat2d, tgt2d)

    sums = partial[:, 0, 0]                              # (n_terms,)
    scale = jnp.float32(-math.log(2) * num_pixels)

    out = {}
    bpp = {kname: sums[i] / scale for i, kname in enumerate(_GROUP_KEYS)}
    out["h_bpp_loss"] = bpp["h"]
    out["l_bpp_loss"] = bpp["l"]
    out["z_h_bpp_loss"] = bpp["z_h"]
    out["z_l_bpp_loss"] = bpp["z_l"]
    out["bpp_loss"] = bpp["h"] + bpp["l"] + bpp["z_h"] + bpp["z_l"]
    out["y_bpp_loss"] = out["l_bpp_loss"] + out["h_bpp_loss"]
    out["z_bpp_loss"] = out["z_h_bpp_loss"] + out["z_l_bpp_loss"]
    out["mse_loss"] = (sums[len(_GROUP_KEYS)] / jnp.float32(n_mse)) \
        * jnp.float32(255.0 ** 2)
    out["loss"] = jnp.float32(lmbda) * out["mse_loss"] + out["bpp_loss"]
    return out


if __name__ == "__main__":
    key = jax.random.PRNGKey(0)
    ks = jax.random.split(key, 6)

    # Small NCHW shapes consistent with an image-compression model's outputs.
    N, C, H, W = 2, 3, 16, 16
    target = jax.random.uniform(ks[0], (N, C, H, W), jnp.float32)
    x_hat = target + 0.05 * jax.random.normal(ks[1], (N, C, H, W), jnp.float32)

    def likelihood(k, shape):
        # likelihoods must be in (0, 1]; keep them strictly positive.
        return jax.random.uniform(k, shape, jnp.float32,
                                  minval=0.05, maxval=1.0)

    likelihoods = {
        "h":   [likelihood(ks[2], (N, 4, 8, 8))],
        "l":   [likelihood(ks[3], (N, 4, 8, 8))],
        "z_h": [likelihood(ks[4], (N, 2, 4, 4))],
        "z_l": [likelihood(ks[5], (N, 2, 4, 4))],
    }
    output = {"likelihoods": likelihoods, "x_hat": x_hat}

    out = rate_distortion_loss2(output, target, lmbda=0.01)
    jax.block_until_ready(out["loss"])

    # Pure-jnp reference (same math as the PyTorch module).
    scale = -math.log(2) * (N * H * W)
    ref_bpp = {k: sum(jnp.sum(jnp.log(t)) for t in v) / scale
               for k, v in likelihoods.items()}
    ref_mse = jnp.mean((x_hat - target) ** 2) * 255.0 ** 2
    ref_loss = 0.01 * ref_mse + sum(ref_bpp.values())

    assert jnp.allclose(out["mse_loss"], ref_mse, rtol=1e-3, atol=1e-4)
    assert jnp.allclose(out["bpp_loss"], sum(ref_bpp.values()),
                        rtol=1e-3, atol=1e-4)
    assert jnp.allclose(out["loss"], ref_loss, rtol=1e-3, atol=1e-4)

    print("KERNEL_OK")
</pallas_src>

<mosaic_0001>
module attributes {stable_mosaic.version = 11 : i64} {
  func.func @kernel(%arg0: i32, %arg1: memref<4x128xf32, #tpu.memory_space<vmem>>, %arg2: memref<4x128xf32, #tpu.memory_space<vmem>>, %arg3: memref<1x128xf32, #tpu.memory_space<vmem>>, %arg4: memref<1x128xf32, #tpu.memory_space<vmem>>, %arg5: memref<12x128xf32, #tpu.memory_space<vmem>>, %arg6: memref<12x128xf32, #tpu.memory_space<vmem>>, %arg7: memref<5x8x128xf32, #tpu.memory_space<vmem>>, %arg8: memref<5x8x128xf32, #tpu.memory_space<vmem>>) attributes {dimension_semantics = [#tpu.dimension_semantics<arbitrary>], iteration_bounds = array<i64: 1>, scalar_prefetch = 0 : i64, scratch_operands = 1 : i64, tpu.core_type = #tpu.core_type<tc>, window_params = [{pipeline_mode = #tpu.pipeline_mode<synchronous>, transform_indices = @transform_0, window_bounds = array<i64: 4, 128>}, {pipeline_mode = #tpu.pipeline_mode<synchronous>, transform_indices = @transform_1, window_bounds = array<i64: 4, 128>}, {pipeline_mode = #tpu.pipeline_mode<synchronous>, transform_indices = @transform_2, window_bounds = array<i64: 1, 128>}, {pipeline_mode = #tpu.pipeline_mode<synchronous>, transform_indices = @transform_3, window_bounds = array<i64: 1, 128>}, {pipeline_mode = #tpu.pipeline_mode<synchronous>, transform_indices = @transform_4, window_bounds = array<i64: 12, 128>}, {pipeline_mode = #tpu.pipeline_mode<synchronous>, transform_indices = @transform_5, window_bounds = array<i64: 12, 128>}, {pipeline_mode = #tpu.pipeline_mode<synchronous>, transform_indices = @transform_6, window_bounds = array<i64: 5, 8, 128>}]} {
    %c0_i32 = arith.constant 0 : i32
    %0 = arith.cmpi eq, %arg0, %c0_i32 : i32
    %1 = arith.extui %0 : i1 to i32
    %c0_i32_0 = arith.constant 0 : i32
    %2 = arith.cmpi ne, %1, %c0_i32_0 : i32
    scf.if %2 {
      %cst_60 = arith.constant 0.000000e+00 : f32
      %108 = vector.broadcast %cst_60 : f32 to vector<5x8x128xf32>
      %c0_61 = arith.constant 0 : index
      %c0_62 = arith.constant 0 : index
      %c0_63 = arith.constant 0 : index
      %109 = vector.load %arg8[%c0_61, %c0_62, %c0_63] : memref<5x8x128xf32, #tpu.memory_space<vmem>>, vector<5x8x128xf32>
      tpu.vector_store %arg8[%c0_61, %c0_62, %c0_63], %108 {strides = array<i32>} : memref<5x8x128xf32, #tpu.memory_space<vmem>>, vector<5x8x128xf32>,
    } else {
    }
    %c0 = arith.constant 0 : index
    %c0_1 = arith.constant 0 : index
    %3 = vector.load %arg1[%c0, %c0_1] : memref<4x128xf32, #tpu.memory_space<vmem>>, vector<4x128xf32>
    %4 = math.log %3 : vector<4x128xf32>
    %c0_2 = arith.constant 0 : index
    %c0_3 = arith.constant 0 : index
    %c0_4 = arith.constant 0 : index
    %5 = vector.load %arg8[%c0_2, %c0_3, %c0_4] : memref<5x8x128xf32, #tpu.memory_space<vmem>>, vector<1x8x128xf32>
    %6 = vector.shape_cast %5 : vector<1x8x128xf32> to vector<8x128xf32>
    %cst = arith.constant 0.000000e+00 : f32
    %7 = vector.broadcast %cst : f32 to vector<8x128xf32>
    %cst_5 = arith.constant dense<0.000000e+00> : vector<128xf32>
    %8 = vector.multi_reduction <add>, %4, %cst_5 [0] : vector<4x128xf32> to vector<128xf32>
    %9 = vector.shape_cast %8 : vector<128xf32> to vector<1x128xf32>
    %10 = tpu.iota {dimensions = array<i32: 0>} : vector<8x128xi32>
    %c0_i32_6 = arith.constant 0 : i32
    %11 = vector.broadcast %c0_i32_6 : i32 to vector<8x128xi32>
    %12 = arith.cmpi eq, %10, %11 : vector<8x128xi32>
    %13 = vector.shape_cast %9 : vector<1x128xf32> to vector<1x128xf32>
    %14 = vector.broadcast %13 : vector<1x128xf32> to vector<8x128xf32>
    %cst_7 = arith.constant 0.000000e+00 : f32
    %15 = vector.broadcast %cst_7 : f32 to vector<8x128xf32>
    %16 = arith.select %12, %14, %15 : vector<8x128xi1>, vector<8x128xf32>
    %17 = arith.addf %7, %16 : vector<8x128xf32>
    %18 = arith.addf %6, %17 : vector<8x128xf32>
    %c0_8 = arith.constant 0 : index
    %c0_9 = arith.constant 0 : index
    %c0_10 = arith.constant 0 : index
    %19 = vector.load %arg8[%c0_8, %c0_9, %c0_10] : memref<5x8x128xf32, #tpu.memory_space<vmem>>, vector<1x8x128xf32>
    %20 = vector.shape_cast %19 : vector<1x8x128xf32> to vector<8x128xf32>
    %21 = vector.shape_cast %18 : vector<8x128xf32> to vector<1x8x128xf32>
    tpu.vector_store %arg8[%c0_8, %c0_9, %c0_10], %21 {strides = array<i32>} : memref<5x8x128xf32, #tpu.memory_space<vmem>>, vector<1x8x128xf32>,
    %c0_11 = arith.constant 0 : index
    %c0_12 = arith.constant 0 : index
    %22 = vector.load %arg2[%c0_11, %c0_12] : memref<4x128xf32, #tpu.memory_space<vmem>>, vector<4x128xf32>
    %23 = math.log %22 : vector<4x128xf32>
    %c1 = arith.constant 1 : index
    %c0_13 = arith.constant 0 : index
    %c0_14 = arith.constant 0 : index
    %24 = vector.load %arg8[%c1, %c0_13, %c0_14] : memref<5x8x128xf32, #tpu.memory_space<vmem>>, vector<1x8x128xf32>
    %25 = vector.shape_cast %24 : vector<1x8x128xf32> to vector<8x128xf32>
    %cst_15 = arith.constant 0.000000e+00 : f32
    %26 = vector.broadcast %cst_15 : f32 to vector<8x128xf32>
    %cst_16 = arith.constant dense<0.000000e+00> : vector<128xf32>
    %27 = vector.multi_reduction <add>, %23, %cst_16 [0] : vector<4x128xf32> to vector<128xf32>
    %28 = vector.shape_cast %27 : vector<128xf32> to vector<1x128xf32>
    %29 = tpu.iota {dimensions = array<i32: 0>} : vector<8x128xi32>
    %c0_i32_17 = arith.constant 0 : i32
    %30 = vector.broadcast %c0_i32_17 : i32 to vector<8x128xi32>
    %31 = arith.cmpi eq, %29, %30 : vector<8x128xi32>
    %32 = vector.shape_cast %28 : vector<1x128xf32> to vector<1x128xf32>
    %33 = vector.broadcast %32 : vector<1x128xf32> to vector<8x128xf32>
    %cst_18 = arith.constant 0.000000e+00 : f32
    %34 = vector.broadcast %cst_18 : f32 to vector<8x128xf32>
    %35 = arith.select %31, %33, %34 : vector<8x128xi1>, vector<8x128xf32>
    %36 = arith.addf %26, %35 : vector<8x128xf32>
    %37 = arith.addf %25, %36 : vector<8x128xf32>
    %c1_19 = arith.constant 1 : index
    %c0_20 = arith.constant 0 : index
    %c0_21 = arith.constant 0 : index
    %38 = vector.load %arg8[%c1_19, %c0_20, %c0_21] : memref<5x8x128xf32, #tpu.memory_space<vmem>>, vector<1x8x128xf32>
    %39 = vector.shape_cast %38 : vector<1x8x128xf32> to vector<8x128xf32>
    %40 = vector.shape_cast %37 : vector<8x128xf32> to vector<1x8x128xf32>
    tpu.vector_store %arg8[%c1_19, %c0_20, %c0_21], %40 {strides = array<i32>} : memref<5x8x128xf32, #tpu.memory_space<vmem>>, vector<1x8x128xf32>,
    %c0_22 = arith.constant 0 : index
    %c0_23 = arith.constant 0 : index
    %41 = vector.load %arg3[%c0_22, %c0_23] : memref<1x128xf32, #tpu.memory_space<vmem>>, vector<1x128xf32>
    %42 = math.log %41 : vector<1x128xf32>
    %c2 = arith.constant 2 : index
    %c0_24 = arith.constant 0 : index
    %c0_25 = arith.constant 0 : index
    %43 = vector.load %arg8[%c2, %c0_24, %c0_25] : memref<5x8x128xf32, #tpu.memory_space<vmem>>, vector<1x8x128xf32>
    %44 = vector.shape_cast %43 : vector<1x8x128xf32> to vector<8x128xf32>
    %cst_26 = arith.constant 0.000000e+00 : f32
    %45 = vector.broadcast %cst_26 : f32 to vector<8x128xf32>
    %cst_27 = arith.constant dense<0.000000e+00> : vector<128xf32>
    %46 = vector.multi_reduction <add>, %42, %cst_27 [0] : vector<1x128xf32> to vector<128xf32>
    %47 = vector.shape_cast %46 : vector<128xf32> to vector<1x128xf32>
    %48 = tpu.iota {dimensions = array<i32: 0>} : vector<8x128xi32>
    %c0_i32_28 = arith.constant 0 : i32
    %49 = vector.broadcast %c0_i32_28 : i32 to vector<8x128xi32>
    %50 = arith.cmpi eq, %48, %49 : vector<8x128xi32>
    %51 = vector.shape_cast %47 : vector<1x128xf32> to vector<1x128xf32>
    %52 = vector.broadcast %51 : vector<1x128xf32> to vector<8x128xf32>
    %cst_29 = arith.constant 0.000000e+00 : f32
    %53 = vector.broadcast %cst_29 : f32 to vector<8x128xf32>
    %54 = arith.select %50, %52, %53 : vector<8x128xi1>, vector<8x128xf32>
    %55 = arith.addf %45, %54 : vector<8x128xf32>
    %56 = arith.addf %44, %55 : vector<8x128xf32>
    %c2_30 = arith.constant 2 : index
    %c0_31 = arith.constant 0 : index
    %c0_32 = arith.constant 0 : index
    %57 = vector.load %arg8[%c2_30, %c0_31, %c0_32] : memref<5x8x128xf32, #tpu.memory_space<vmem>>, vector<1x8x128xf32>
    %58 = vector.shape_cast %57 : vector<1x8x128xf32> to vector<8x128xf32>
    %59 = vector.shape_cast %56 : vector<8x128xf32> to vector<1x8x128xf32>
    tpu.vector_store %arg8[%c2_30, %c0_31, %c0_32], %59 {strides = array<i32>} : memref<5x8x128xf32, #tpu.memory_space<vmem>>, vector<1x8x128xf32>,
    %c0_33 = arith.constant 0 : index
    %c0_34 = arith.constant 0 : index
    %60 = vector.load %arg4[%c0_33, %c0_34] : memref<1x128xf32, #tpu.memory_space<vmem>>, vector<1x128xf32>
    %61 = math.log %60 : vector<1x128xf32>
    %c3 = arith.constant 3 : index
    %c0_35 = arith.constant 0 : index
    %c0_36 = arith.constant 0 : index
    %62 = vector.load %arg8[%c3, %c0_35, %c0_36] : memref<5x8x128xf32, #tpu.memory_space<vmem>>, vector<1x8x128xf32>
    %63 = vector.shape_cast %62 : vector<1x8x128xf32> to vector<8x128xf32>
    %cst_37 = arith.constant 0.000000e+00 : f32
    %64 = vector.broadcast %cst_37 : f32 to vector<8x128xf32>
    %cst_38 = arith.constant dense<0.000000e+00> : vector<128xf32>
    %65 = vector.multi_reduction <add>, %61, %cst_38 [0] : vector<1x128xf32> to vector<128xf32>
    %66 = vector.shape_cast %65 : vector<128xf32> to vector<1x128xf32>
    %67 = tpu.iota {dimensions = array<i32: 0>} : vector<8x128xi32>
    %c0_i32_39 = arith.constant 0 : i32
    %68 = vector.broadcast %c0_i32_39 : i32 to vector<8x128xi32>
    %69 = arith.cmpi eq, %67, %68 : vector<8x128xi32>
    %70 = vector.shape_cast %66 : vector<1x128xf32> to vector<1x128xf32>
    %71 = vector.broadcast %70 : vector<1x128xf32> to vector<8x128xf32>
    %cst_40 = arith.constant 0.000000e+00 : f32
    %72 = vector.broadcast %cst_40 : f32 to vector<8x128xf32>
    %73 = arith.select %69, %71, %72 : vector<8x128xi1>, vector<8x128xf32>
    %74 = arith.addf %64, %73 : vector<8x128xf32>
    %75 = arith.addf %63, %74 : vector<8x128xf32>
    %c3_41 = arith.constant 3 : index
    %c0_42 = arith.constant 0 : index
    %c0_43 = arith.constant 0 : index
    %76 = vector.load %arg8[%c3_41, %c0_42, %c0_43] : memref<5x8x128xf32, #tpu.memory_space<vmem>>, vector<1x8x128xf32>
    %77 = vector.shape_cast %76 : vector<1x8x128xf32> to vector<8x128xf32>
    %78 = vector.shape_cast %75 : vector<8x128xf32> to vector<1x8x128xf32>
    tpu.vector_store %arg8[%c3_41, %c0_42, %c0_43], %78 {strides = array<i32>} : memref<5x8x128xf32, #tpu.memory_space<vmem>>, vector<1x8x128xf32>,
    %c0_44 = arith.constant 0 : index
    %c0_45 = arith.constant 0 : index
    %79 = vector.load %arg5[%c0_44, %c0_45] : memref<12x128xf32, #tpu.memory_space<vmem>>, vector<12x128xf32>
    %c0_46 = arith.constant 0 : index
    %c0_47 = arith.constant 0 : index
    %80 = vector.load %arg6[%c0_46, %c0_47] : memref<12x128xf32, #tpu.memory_space<vmem>>, vector<12x128xf32>
    %81 = arith.subf %79, %80 : vector<12x128xf32>
    %82 = arith.mulf %81, %81 : vector<12x128xf32>
    %c4 = arith.constant 4 : index
    %c0_48 = arith.constant 0 : index
    %c0_49 = arith.constant 0 : index
    %83 = vector.load %arg8[%c4, %c0_48, %c0_49] : memref<5x8x128xf32, #tpu.memory_space<vmem>>, vector<1x8x128xf32>
    %84 = vector.shape_cast %83 : vector<1x8x128xf32> to vector<8x128xf32>
    %cst_50 = arith.constant 0.000000e+00 : f32
    %85 = vector.broadcast %cst_50 : f32 to vector<8x128xf32>
    %86 = vector.extract_strided_slice %82 {offsets = [0, 0], sizes = [8, 128], strides = [1, 1]} : vector<12x128xf32> to vector<8x128xf32>
    %87 = vector.shape_cast %86 : vector<8x128xf32> to vector<1x8x128xf32>
    %cst_51 = arith.constant dense<0.000000e+00> : vector<8x128xf32>
    %88 = vector.multi_reduction <add>, %87, %cst_51 [0] : vector<1x8x128xf32> to vector<8x128xf32>
    %89 = arith.addf %85, %88 : vector<8x128xf32>
    %90 = vector.extract_strided_slice %82 {offsets = [8, 0], sizes = [4, 128], strides = [1, 1]} : vector<12x128xf32> to vector<4x128xf32>
    %cst_52 = arith.constant dense<0.000000e+00> : vector<128xf32>
    %91 = vector.multi_reduction <add>, %90, %cst_52 [0] : vector<4x128xf32> to vector<128xf32>
    %92 = vector.shape_cast %91 : vector<128xf32> to vector<1x128xf32>
    %93 = tpu.iota {dimensions = array<i32: 0>} : vector<8x128xi32>
    %c0_i32_53 = arith.constant 0 : i32
    %94 = vector.broadcast %c0_i32_53 : i32 to vector<8x128xi32>
    %95 = arith.cmpi eq, %93, %94 : vector<8x128xi32>
    %96 = vector.shape_cast %92 : vector<1x128xf32> to vector<1x128xf32>
    %97 = vector.broadcast %96 : vector<1x128xf32> to vector<8x128xf32>
    %cst_54 = arith.constant 0.000000e+00 : f32
    %98 = vector.broadcast %cst_54 : f32 to vector<8x128xf32>
    %99 = arith.select %95, %97, %98 : vector<8x128xi1>, vector<8x128xf32>
    %100 = arith.addf %89, %99 : vector<8x128xf32>
    %101 = arith.addf %84, %100 : vector<8x128xf32>
    %c4_55 = arith.constant 4 : index
    %c0_56 = arith.constant 0 : index
    %c0_57 = arith.constant 0 : index
    %102 = vector.load %arg8[%c4_55, %c0_56, %c0_57] : memref<5x8x128xf32, #tpu.memory_space<vmem>>, vector<1x8x128xf32>
    %103 = vector.shape_cast %102 : vector<1x8x128xf32> to vector<8x128xf32>
    %104 = vector.shape_cast %101 : vector<8x128xf32> to vector<1x8x128xf32>
    tpu.vector_store %arg8[%c4_55, %c0_56, %c0_57], %104 {strides = array<i32>} : memref<5x8x128xf32, #tpu.memory_space<vmem>>, vector<1x8x128xf32>,
    %c0_i32_58 = arith.constant 0 : i32
    %105 = arith.cmpi eq, %arg0, %c0_i32_58 : i32
    %106 = arith.extui %105 : i1 to i32
    %c0_i32_59 = arith.constant 0 : i32
    %107 = arith.cmpi ne, %106, %c0_i32_59 : i32
    scf.if %107 {
      %c0_60 = arith.constant 0 : index
      %c0_61 = arith.constant 0 : index
      %c0_62 = arith.constant 0 : index
      %108 = vector.load %arg8[%c0_60, %c0_61, %c0_62] : memref<5x8x128xf32, #tpu.memory_space<vmem>>, vector<1x8x128xf32>
      %109 = vector.shape_cast %108 : vector<1x8x128xf32> to vector<8x128xf32>
      %cst_63 = arith.constant dense<0.000000e+00> : vector<8xf32>
      %110 = vector.multi_reduction <add>, %109, %cst_63 [1] : vector<8x128xf32> to vector<8xf32>
      %111 = vector.shape_cast %110 : vector<8xf32> to vector<8x1xf32>
      %cst_64 = arith.constant dense<0.000000e+00> : vector<1xf32>
      %112 = vector.multi_reduction <add>, %111, %cst_64 [0] : vector<8x1xf32> to vector<1xf32>
      %113 = vector.shape_cast %112 : vector<1xf32> to vector<1x1xf32>
      %114 = vector.shape_cast %113 : vector<1x1xf32> to vector<1x1xf32>
      %115 = vector.broadcast %114 : vector<1x1xf32> to vector<8x128xf32>
      %c0_65 = arith.constant 0 : index
      %c0_66 = arith.constant 0 : index
      %c0_67 = arith.constant 0 : index
      %116 = vector.load %arg7[%c0_65, %c0_66, %c0_67] : memref<5x8x128xf32, #tpu.memory_space<vmem>>, vector<1x8x128xf32>
      %117 = vector.shape_cast %116 : vector<1x8x128xf32> to vector<8x128xf32>
      %118 = vector.shape_cast %115 : vector<8x128xf32> to vector<1x8x128xf32>
      tpu.vector_store %arg7[%c0_65, %c0_66, %c0_67], %118 {strides = array<i32>} : memref<5x8x128xf32, #tpu.memory_space<vmem>>, vector<1x8x128xf32>,
      %c1_68 = arith.constant 1 : index
      %c0_69 = arith.constant 0 : index
      %c0_70 = arith.constant 0 : index
      %119 = vector.load %arg8[%c1_68, %c0_69, %c0_70] : memref<5x8x128xf32, #tpu.memory_space<vmem>>, vector<1x8x128xf32>
      %120 = vector.shape_cast %119 : vector<1x8x128xf32> to vector<8x128xf32>
      %cst_71 = arith.constant dense<0.000000e+00> : vector<8xf32>
      %121 = vector.multi_reduction <add>, %120, %cst_71 [1] : vector<8x128xf32> to vector<8xf32>
      %122 = vector.shape_cast %121 : vector<8xf32> to vector<8x1xf32>
      %cst_72 = arith.constant dense<0.000000e+00> : vector<1xf32>
      %123 = vector.multi_reduction <add>, %122, %cst_72 [0] : vector<8x1xf32> to vector<1xf32>
      %124 = vector.shape_cast %123 : vector<1xf32> to vector<1x1xf32>
      %125 = vector.shape_cast %124 : vector<1x1xf32> to vector<1x1xf32>
      %126 = vector.broadcast %125 : vector<1x1xf32> to vector<8x128xf32>
      %c1_73 = arith.constant 1 : index
      %c0_74 = arith.constant 0 : index
      %c0_75 = arith.constant 0 : index
      %127 = vector.load %arg7[%c1_73, %c0_74, %c0_75] : memref<5x8x128xf32, #tpu.memory_space<vmem>>, vector<1x8x128xf32>
      %128 = vector.shape_cast %127 : vector<1x8x128xf32> to vector<8x128xf32>
      %129 = vector.shape_cast %126 : vector<8x128xf32> to vector<1x8x128xf32>
      tpu.vector_store %arg7[%c1_73, %c0_74, %c0_75], %129 {strides = array<i32>} : memref<5x8x128xf32, #tpu.memory_space<vmem>>, vector<1x8x128xf32>,
      %c2_76 = arith.constant 2 : index
      %c0_77 = arith.constant 0 : index
      %c0_78 = arith.constant 0 : index
      %130 = vector.load %arg8[%c2_76, %c0_77, %c0_78] : memref<5x8x128xf32, #tpu.memory_space<vmem>>, vector<1x8x128xf32>
      %131 = vector.shape_cast %130 : vector<1x8x128xf32> to vector<8x128xf32>
      %cst_79 = arith.constant dense<0.000000e+00> : vector<8xf32>
      %132 = vector.multi_reduction <add>, %131, %cst_79 [1] : vector<8x128xf32> to vector<8xf32>
      %133 = vector.shape_cast %132 : vector<8xf32> to vector<8x1xf32>
      %cst_80 = arith.constant dense<0.000000e+00> : vector<1xf32>
      %134 = vector.multi_reduction <add>, %133, %cst_80 [0] : vector<8x1xf32> to vector<1xf32>
      %135 = vector.shape_cast %134 : vector<1xf32> to vector<1x1xf32>
      %136 = vector.shape_cast %135 : vector<1x1xf32> to vector<1x1xf32>
      %137 = vector.broadcast %136 : vector<1x1xf32> to vector<8x128xf32>
      %c2_81 = arith.constant 2 : index
      %c0_82 = arith.constant 0 : index
      %c0_83 = arith.constant 0 : index
      %138 = vector.load %arg7[%c2_81, %c0_82, %c0_83] : memref<5x8x128xf32, #tpu.memory_space<vmem>>, vector<1x8x128xf32>
      %139 = vector.shape_cast %138 : vector<1x8x128xf32> to vector<8x128xf32>
      %140 = vector.shape_cast %137 : vector<8x128xf32> to vector<1x8x128xf32>
      tpu.vector_store %arg7[%c2_81, %c0_82, %c0_83], %140 {strides = array<i32>} : memref<5x8x128xf32, #tpu.memory_space<vmem>>, vector<1x8x128xf32>,
      %c3_84 = arith.constant 3 : index
      %c0_85 = arith.constant 0 : index
      %c0_86 = arith.constant 0 : index
      %141 = vector.load %arg8[%c3_84, %c0_85, %c0_86] : memref<5x8x128xf32, #tpu.memory_space<vmem>>, vector<1x8x128xf32>
      %142 = vector.shape_cast %141 : vector<1x8x128xf32> to vector<8x128xf32>
      %cst_87 = arith.constant dense<0.000000e+00> : vector<8xf32>
      %143 = vector.multi_reduction <add>, %142, %cst_87 [1] : vector<8x128xf32> to vector<8xf32>
      %144 = vector.shape_cast %143 : vector<8xf32> to vector<8x1xf32>
      %cst_88 = arith.constant dense<0.000000e+00> : vector<1xf32>
      %145 = vector.multi_reduction <add>, %144, %cst_88 [0] : vector<8x1xf32> to vector<1xf32>
      %146 = vector.shape_cast %145 : vector<1xf32> to vector<1x1xf32>
      %147 = vector.shape_cast %146 : vector<1x1xf32> to vector<1x1xf32>
      %148 = vector.broadcast %147 : vector<1x1xf32> to vector<8x128xf32>
      %c3_89 = arith.constant 3 : index
      %c0_90 = arith.constant 0 : index
      %c0_91 = arith.constant 0 : index
      %149 = vector.load %arg7[%c3_89, %c0_90, %c0_91] : memref<5x8x128xf32, #tpu.memory_space<vmem>>, vector<1x8x128xf32>
      %150 = vector.shape_cast %149 : vector<1x8x128xf32> to vector<8x128xf32>
      %151 = vector.shape_cast %148 : vector<8x128xf32> to vector<1x8x128xf32>
      tpu.vector_store %arg7[%c3_89, %c0_90, %c0_91], %151 {strides = array<i32>} : memref<5x8x128xf32, #tpu.memory_space<vmem>>, vector<1x8x128xf32>,
      %c4_92 = arith.constant 4 : index
      %c0_93 = arith.constant 0 : index
      %c0_94 = arith.constant 0 : index
      %152 = vector.load %arg8[%c4_92, %c0_93, %c0_94] : memref<5x8x128xf32, #tpu.memory_space<vmem>>, vector<1x8x128xf32>
      %153 = vector.shape_cast %152 : vector<1x8x128xf32> to vector<8x128xf32>
      %cst_95 = arith.constant dense<0.000000e+00> : vector<8xf32>
      %154 = vector.multi_reduction <add>, %153, %cst_95 [1] : vector<8x128xf32> to vector<8xf32>
      %155 = vector.shape_cast %154 : vector<8xf32> to vector<8x1xf32>
      %cst_96 = arith.constant dense<0.000000e+00> : vector<1xf32>
      %156 = vector.multi_reduction <add>, %155, %cst_96 [0] : vector<8x1xf32> to vector<1xf32>
      %157 = vector.shape_cast %156 : vector<1xf32> to vector<1x1xf32>
      %158 = vector.shape_cast %157 : vector<1x1xf32> to vector<1x1xf32>
      %159 = vector.broadcast %158 : vector<1x1xf32> to vector<8x128xf32>
      %c4_97 = arith.constant 4 : index
      %c0_98 = arith.constant 0 : index
      %c0_99 = arith.constant 0 : index
      %160 = vector.load %arg7[%c4_97, %c0_98, %c0_99] : memref<5x8x128xf32, #tpu.memory_space<vmem>>, vector<1x8x128xf32>
      %161 = vector.shape_cast %160 : vector<1x8x128xf32> to vector<8x128xf32>
      %162 = vector.shape_cast %159 : vector<8x128xf32> to vector<1x8x128xf32>
      tpu.vector_store %arg7[%c4_97, %c0_98, %c0_99], %162 {strides = array<i32>} : memref<5x8x128xf32, #tpu.memory_space<vmem>>, vector<1x8x128xf32>,
    } else {
    }
    return
  }
  func.func @transform_0(%arg0: i32) -> (i32, i32) {
    %c0_i32 = arith.constant 0 : i32
    %c0_i32_0 = arith.constant 0 : i32
    %c0_i32_1 = arith.constant 0 : i32
    return %c0_i32, %c0_i32_0 : i32, i32
  }
  func.func @transform_1(%arg0: i32) -> (i32, i32) {
    %c0_i32 = arith.constant 0 : i32
    %c0_i32_0 = arith.constant 0 : i32
    %c0_i32_1 = arith.constant 0 : i32
    return %c0_i32, %c0_i32_0 : i32, i32
  }
  func.func @transform_2(%arg0: i32) -> (i32, i32) {
    %c0_i32 = arith.constant 0 : i32
    %c0_i32_0 = arith.constant 0 : i32
    %c0_i32_1 = arith.constant 0 : i32
    return %c0_i32, %c0_i32_0 : i32, i32
  }
  func.func @transform_3(%arg0: i32) -> (i32, i32) {
    %c0_i32 = arith.constant 0 : i32
    %c0_i32_0 = arith.constant 0 : i32
    %c0_i32_1 = arith.constant 0 : i32
    return %c0_i32, %c0_i32_0 : i32, i32
  }
  func.func @transform_4(%arg0: i32) -> (i32, i32) {
    %c0_i32 = arith.constant 0 : i32
    %c0_i32_0 = arith.constant 0 : i32
    %c0_i32_1 = arith.constant 0 : i32
    return %c0_i32, %c0_i32_0 : i32, i32
  }
  func.func @transform_5(%arg0: i32) -> (i32, i32) {
    %c0_i32 = arith.constant 0 : i32
    %c0_i32_0 = arith.constant 0 : i32
    %c0_i32_1 = arith.constant 0 : i32
    return %c0_i32, %c0_i32_0 : i32, i32
  }
  func.func @transform_6(%arg0: i32) -> (i32, i32, i32) {
    %c0_i32 = arith.constant 0 : i32
    %c0_i32_0 = arith.constant 0 : i32
    %c0_i32_1 = arith.constant 0 : i32
    %c0_i32_2 = arith.constant 0 : i32
    return %c0_i32, %c0_i32_0, %c0_i32_1 : i32, i32, i32
  }
}

</mosaic_0001>

<bundles_post_ra>
// kernel: rate_distortion_loss2.1
= control target key start
LH: loop header
LB: loop body
LE: loop exit
PB: predicated region body
PF: predicated region fallthrough
CT: control target
= control target key end

     0   :  { %v44_v5 = vlaneseq  ;;  %vm36_vm0 = vcmask 1043456   ;;  %s277_s2 = inlined_call_operand.vmem [shape: f32[1,128], index: 2, kind: input, shape index: {}]   ;;  %s278_s0 = inlined_call_operand.vmem [shape: f32[4,128], index: 0, kind: input, shape index: {}]   ;;  %s279_s3 = inlined_call_operand.vmem [shape: f32[1,128], index: 3, kind: input, shape index: {}]   ;;  %s280_s1 = inlined_call_operand.vmem [shape: f32[4,128], index: 1, kind: input, shape index: {}]   ;;  %s281_s4 = inlined_call_operand.vmem [shape: f32[12,128], index: 4, kind: input, shape index: {}]   ;;  %s282_s5 = inlined_call_operand.vmem [shape: f32[12,128], index: 5, kind: input, shape index: {}]   ;;  %s283_s6 = inlined_call_operand.vmem [shape: f32[5,8,128], index: 6, kind: output, shape index: {}]  }
   0x1   :  { %v67_v0 = vld [vmem:[%s277_s2] sm:$0x1]  ;;  %v100_v4 = vld [vmem:[%s281_s4 + $0x8] sm:$0xf] }
   0x2   :  { %v32_v1 = vld [vmem:[%s278_s0] sm:$0xf]  ;;  %187 = vlog2.f32 %v67_v0  ;;  %v102_v6 = vld [vmem:[%s282_s5 + $0x8] sm:$0xf]  ;;  %v45_v8 = vshrl.u32 %v44_v5, 7 }
   0x3   :  { %v83_v2 = vld [vmem:[%s279_s3] sm:$0x1]  ;;  %189 = vlog2.f32 %v32_v1  ;;  %v104_v7 = vsub.f32 %v100_v4, %v102_v6 }
   0x4   :  { %v51_v3 = vld [vmem:[%s280_s1] sm:$0xf]  ;;  %191 = vlog2.f32 %v83_v2  ;;  %v76_v12 = vsub.s32 0, %v45_v8  ;;  %vm46_vm1 = vcmp.eq.s32.totalorder %v45_v8, 0 }
   0x5   :  { %193 = vlog2.f32 %v51_v3  ;;  %v106_v9 = vmul.f32 %v104_v7, %v104_v7  ;;  %v99_v37 = vld [vmem:[%s281_s4] sm:$0xff] }
   0x6   :  { %v101_v38 = vld [vmem:[%s282_s5] sm:$0xff] }
   0x7   :  { %v111_v10 = vsel %vm36_vm0, %v106_v9, 0.0  ;;  %v103_v42 = vsub.f32 %v99_v37, %v101_v38 }
   0x8   :  { %v112_v11 = vrot.slane %v111_v10, 4 }
   0x9   :  { %v105_v48 = vmul.f32 %v103_v42, %v103_v42 }
   0xa   :  { %v113_v14 = vadd.f32 %v112_v11, %v111_v10 }
   0xc   :  { %v188_v13 = vpop.eup %187  ;;  %v114_v22 = vrot.slane %v113_v14, 2 }
   0xd   :  { %v190_v15 = vpop.eup %189  ;;  %v69_v16 = vmul.f32 0.6931472, %v188_v13 }
   0xe   :  { %v192_v17 = vpop.eup %191  ;;  %v34_v18 = vmul.f32 0.6931472, %v190_v15  ;;  %v115_v32 = vadd.f32 %v114_v22, %v113_v14 }
   0xf   :  { %v194_v19 = vpop.eup %193  ;;  %v77_v20 = vrot.slane %v69_v16, %v76_v12  ;;  %v85_v21 = vmul.f32 0.6931472, %v192_v17 }
  0x10   :  { %v37_v23 = vsel %vm36_vm0, %v34_v18, 0.0  ;;  %v53_v24 = vmul.f32 0.6931472, %v194_v19  ;;  %v116_v39 = vrot.slane %v115_v32, 1 }
  0x11   :  { %v79_v25 = vsel %vm46_vm1, %v77_v20, 0.0  ;;  %v38_v26 = vrot.slane %v37_v23, 4  ;;  %v93_v27 = vrot.slane %v85_v21, %v76_v12 }
  0x12   :  { %147 = vadd.xlane.f32.xlu1 %v79_v25  ;;  %v56_v28 = vsel %vm36_vm0, %v53_v24, 0.0  ;;  %v117_v45 = vadd.f32 %v116_v39, %v115_v32 }
  0x13   :  { %v39_v29 = vadd.f32 %v38_v26, %v37_v23  ;;  %v95_v30 = vsel %vm46_vm1, %v93_v27, 0.0  ;;  %v57_v31 = vrot.slane %v56_v28, 4 }
  0x14   :  { %v118_v50 = vsel %vm46_vm1, %v117_v45, 0.0 }
  0x15   :  { %v40_v33 = vrot.slane %v39_v29, 2  ;;  %v58_v34 = vadd.f32 %v57_v31, %v56_v28  ;;  %v119_v51 = vadd.f32 %v118_v50, %v105_v48 }
  0x16   :  { %158 = vadd.xlane.f32.xlu1 %v95_v30 }
  0x17   :  { %v41_v35 = vadd.f32 %v40_v33, %v39_v29  ;;  %v59_v36 = vrot.slane %v58_v34, 2 }
  0x19   :  { %v42_v40 = vrot.slane %v41_v35, 1  ;;  %v60_v41 = vadd.f32 %v59_v36, %v58_v34 }
  0x1b   :  { %v43_v43 = vadd.f32 %v42_v40, %v41_v35  ;;  %v61_v44 = vrot.slane %v60_v41, 1 }
  0x1d   :  { %v47_v46 = vsel %vm46_vm1, %v43_v43, 0.0  ;;  %v62_v47 = vadd.f32 %v61_v44, %v60_v41 }
  0x1e   :  { %126 = vadd.xlane.f32.xlu0 %v47_v46 }
  0x1f   :  { %v63_v49 = vsel %vm46_vm1, %v62_v47, 0.0 }
  0x22   :  { %136 = vadd.xlane.f32.xlu0 %v63_v49 }
  0x26   :  { %169 = vadd.xlane.f32.xlu0 %v119_v51 }
  0x9f   :  { %v148_v52 = vpop.xlane.xlu1 %147 }
  0xa0   :  { %v149_v53 = vrot.slane %v148_v52, 4 }
  0xa2   :  { %v150_v54 = vadd.f32 %v149_v53, %v148_v52 }
  0xa3   :  { %v159_v55 = vpop.xlane.xlu1 %158 }
  0xa4   :  { %v151_v56 = vrot.slane %v150_v54, 2  ;;  %v160_v57 = vrot.slane %v159_v55, 4 }
  0xa6   :  { %v152_v58 = vadd.f32 %v151_v56, %v150_v54  ;;  %v161_v59 = vadd.f32 %v160_v57, %v159_v55 }
  0xa8   :  { %v153_v60 = vrot.slane %v152_v58, 1  ;;  %v162_v61 = vrot.slane %v161_v59, 2 }
  0xaa   :  { %v154_v62 = vadd.f32 %v153_v60, %v152_v58  ;;  %v163_v63 = vadd.f32 %v162_v61, %v161_v59 }
  0xab   :  { %v127_v0 = vpop.xlane.xlu0 %126 }
  0xac   :  { %184 = vst [vmem:[%s283_s6 + $0x10] sm:$0xff] %v154_v62  ;;  %v128_v1 = vrot.slane %v127_v0, 4  ;;  %v164_v2 = vrot.slane %v163_v63, 1 }
  0xae   :  { %v129_v3 = vadd.f32 %v128_v1, %v127_v0  ;;  %v165_v4 = vadd.f32 %v164_v2, %v163_v63 }
  0xaf   :  { %v137_v5 = vpop.xlane.xlu0 %136 }
  0xb0   :  { %v130_v6 = vrot.slane %v129_v3, 2  ;;  %185 = vst [vmem:[%s283_s6 + $0x18] sm:$0xff] %v165_v4  ;;  %v138_v7 = vrot.slane %v137_v5, 4 }
  0xb2   :  { %v131_v8 = vadd.f32 %v130_v6, %v129_v3  ;;  %v139_v9 = vadd.f32 %v138_v7, %v137_v5 }
  0xb3   :  { %v170_v10 = vpop.xlane.xlu0 %169 }
  0xb4   :  { %v132_v11 = vrot.slane %v131_v8, 1  ;;  %v140_v12 = vrot.slane %v139_v9, 2  ;;  %v171_v13 = vrot.slane %v170_v10, 4 }
  0xb6   :  { %v133_v14 = vadd.f32 %v132_v11, %v131_v8  ;;  %v141_v15 = vadd.f32 %v140_v12, %v139_v9  ;;  %v172_v16 = vadd.f32 %v171_v13, %v170_v10 }
  0xb8   :  { %134 = vst [vmem:[%s283_s6] sm:$0xff] %v133_v14  ;;  %v142_v17 = vrot.slane %v141_v15, 1  ;;  %v173_v18 = vrot.slane %v172_v16, 2 }
  0xba   :  { %v143_v19 = vadd.f32 %v142_v17, %v141_v15  ;;  %v174_v20 = vadd.f32 %v173_v18, %v172_v16 }
  0xbc   :  { %183 = vst [vmem:[%s283_s6 + $0x8] sm:$0xff] %v143_v19  ;;  %v175_v21 = vrot.slane %v174_v20, 1 }
  0xbe   :  { %v176_v22 = vadd.f32 %v175_v21, %v174_v20 }
  0xc0   :  { %186 = vst [vmem:[%s283_s6 + $0x20] sm:$0xff] %v176_v22 }

</bundles_post_ra>
